<compile_context>
chip_gen: v7x
topology: tpu7x:2x2x1
jax: 0.10.0
libtpu: 0.0.40
codegen_flags: <defaults>
</compile_context>

<pallas_src>
import jax
import jax.numpy as jnp
from jax.experimental import pallas as pl
from jax.experimental.pallas import tpu as pltpu

_LANES = 1024      # lane-dense last dim (multiple of 128)
_TILE_ROWS = 512   # up to (512, 1024) f32 = 2 MiB per block


def _mish_kernel(x_ref, o_ref):
    x = x_ref[...].astype(jnp.float32)
    # tanh(softplus(x)) = (e^{2x} + 2 e^x) / (e^{2x} + 2 e^x + 2), written via
    # t = exp(-|x|) for stability:
    #   x >= 0:  num = 1 + 2 t,     den = num + 2 t^2
    #   x <  0:  num = t^2 + 2 t,   den = num + 2
    t = jnp.exp(-jnp.abs(x))                        # single EUP transcendental
    pos = x >= 0.0
    num = jnp.where(pos, 1.0 + 2.0 * t, t * (t + 2.0))
    den = num + jnp.where(pos, 2.0 * t * t, 2.0)    # den in [1, 5]
    r = pl.reciprocal(den, approx=True)             # EUP vrcp (separate slot)
    r = r * (2.0 - den * r)                         # Newton step 1 (VPU, ~free)
    r = r * (2.0 - den * r)                         # Newton step 2 -> f32 exact
    o_ref[...] = (x * num * r).astype(o_ref.dtype)


def mish(x: jax.Array) -> jax.Array:
    """Elementwise Mish: x * tanh(softplus(x)). Matches torch semantics/dtype."""
    orig_shape = x.shape
    n = x.size
    if n == 0:
        return x

    itemsize = jnp.dtype(x.dtype).itemsize
    rows = pl.cdiv(n, _LANES)
    # Keep the sublane (second-to-last) tile dim a multiple of 8.
    tile_r = min(_TILE_ROWS, ((rows + 7) // 8) * 8)
    grid_r = pl.cdiv(rows, tile_r)
    rows_padded = grid_r * tile_r
    n_padded = rows_padded * _LANES

    xf = jnp.ravel(x)
    if n_padded != n:
        xf = jnp.pad(xf, (0, n_padded - n))
    x2 = xf.reshape(rows_padded, _LANES)

    out = pl.pallas_call(
        _mish_kernel,
        out_shape=jax.ShapeDtypeStruct((rows_padded, _LANES), x.dtype),
        grid_spec=pltpu.PrefetchScalarGridSpec(
            num_scalar_prefetch=0,
            grid=(grid_r,),
            in_specs=[pl.BlockSpec((tile_r, _LANES), lambda i: (i, 0))],
            out_specs=pl.BlockSpec((tile_r, _LANES), lambda i: (i, 0)),
        ),
        compiler_params=pltpu.CompilerParams(
            dimension_semantics=("parallel",),   # lets v7x shard across both TCs
        ),
        cost_estimate=pl.CostEstimate(
            flops=12 * n_padded,
            transcendentals=2 * n_padded,
            bytes_accessed=2 * n_padded * itemsize,
        ),
    )(x2)

    return out.reshape(-1)[:n].reshape(orig_shape)


if __name__ == "__main__":
    key = jax.random.PRNGKey(0)
    # glow-tts residual conv uses (batch, channels, time) inputs.
    B, C, T = 2, 4, 16
    x = jax.random.normal(key, (B, C, T), dtype=jnp.float32)

    y = mish(x)
    jax.block_until_ready(y)

    # Sanity check against a pure-JAX reference (torch semantics).
    ref = x * jnp.tanh(jax.nn.softplus(x))
    assert y.shape == x.shape and y.dtype == x.dtype
    err = float(jnp.max(jnp.abs(y - ref)))
    assert err < 1e-5, f"max abs err {err}"

    print("KERNEL_OK")
</pallas_src>

<mosaic_0001>
module attributes {stable_mosaic.version = 11 : i64} {
  func.func @_mish_kernel(%arg0: i32, %arg1: memref<8x1024xf32, #tpu.memory_space<vmem>>, %arg2: memref<8x1024xf32, #tpu.memory_space<vmem>>) attributes {dimension_semantics = [#tpu.dimension_semantics<parallel>], iteration_bounds = array<i64: 1>, scalar_prefetch = 0 : i64, scratch_operands = 0 : i64, tpu.core_type = #tpu.core_type<tc>, window_params = [{transform_indices = @transform_0, window_bounds = array<i64: 8, 1024>}, {transform_indices = @transform_1, window_bounds = array<i64: 8, 1024>}]} {
    %c0 = arith.constant 0 : index
    %c0_0 = arith.constant 0 : index
    %0 = vector.load %arg1[%c0, %c0_0] : memref<8x1024xf32, #tpu.memory_space<vmem>>, vector<8x1024xf32>
    %1 = math.absf %0 : vector<8x1024xf32>
    %cst = arith.constant 0.000000e+00 : f32
    %2 = vector.broadcast %cst : f32 to vector<8x1024xf32>
    %3 = arith.subf %2, %1 : vector<8x1024xf32>
    %4 = math.exp %3 : vector<8x1024xf32>
    %cst_1 = arith.constant 0.000000e+00 : f32
    %5 = vector.broadcast %cst_1 : f32 to vector<8x1024xf32>
    %6 = arith.cmpf oge, %0, %5 : vector<8x1024xf32>
    %cst_2 = arith.constant 2.000000e+00 : f32
    %7 = vector.broadcast %cst_2 : f32 to vector<8x1024xf32>
    %8 = arith.mulf %7, %4 : vector<8x1024xf32>
    %cst_3 = arith.constant 1.000000e+00 : f32
    %9 = vector.broadcast %cst_3 : f32 to vector<8x1024xf32>
    %10 = arith.addf %9, %8 : vector<8x1024xf32>
    %cst_4 = arith.constant 2.000000e+00 : f32
    %11 = vector.broadcast %cst_4 : f32 to vector<8x1024xf32>
    %12 = arith.addf %4, %11 : vector<8x1024xf32>
    %13 = arith.mulf %4, %12 : vector<8x1024xf32>
    %14 = arith.select %6, %10, %13 : vector<8x1024xi1>, vector<8x1024xf32>
    %cst_5 = arith.constant 2.000000e+00 : f32
    %15 = vector.broadcast %cst_5 : f32 to vector<8x1024xf32>
    %16 = arith.mulf %15, %4 : vector<8x1024xf32>
    %17 = arith.mulf %16, %4 : vector<8x1024xf32>
    %cst_6 = arith.constant 2.000000e+00 : f32
    %18 = vector.broadcast %cst_6 : f32 to vector<8x1024xf32>
    %19 = arith.select %6, %17, %18 : vector<8x1024xi1>, vector<8x1024xf32>
    %20 = arith.addf %14, %19 : vector<8x1024xf32>
    %21 = tpu.reciprocal %20 {approx = true} : vector<8x1024xf32> -> vector<8x1024xf32>
    %22 = arith.mulf %20, %21 : vector<8x1024xf32>
    %cst_7 = arith.constant 2.000000e+00 : f32
    %23 = vector.broadcast %cst_7 : f32 to vector<8x1024xf32>
    %24 = arith.subf %23, %22 : vector<8x1024xf32>
    %25 = arith.mulf %21, %24 : vector<8x1024xf32>
    %26 = arith.mulf %20, %25 : vector<8x1024xf32>
    %cst_8 = arith.constant 2.000000e+00 : f32
    %27 = vector.broadcast %cst_8 : f32 to vector<8x1024xf32>
    %28 = arith.subf %27, %26 : vector<8x1024xf32>
    %29 = arith.mulf %25, %28 : vector<8x1024xf32>
    %30 = arith.mulf %0, %14 : vector<8x1024xf32>
    %31 = arith.mulf %30, %29 : vector<8x1024xf32>
    %c0_9 = arith.constant 0 : index
    %c0_10 = arith.constant 0 : index
    %32 = vector.load %arg2[%c0_9, %c0_10] : memref<8x1024xf32, #tpu.memory_space<vmem>>, vector<8x1024xf32>
    tpu.vector_store %arg2[%c0_9, %c0_10], %31 {strides = array<i32>} : memref<8x1024xf32, #tpu.memory_space<vmem>>, vector<8x1024xf32>,
    return
  }
  func.func @transform_0(%arg0: i32) -> (i32, i32) {
    %c0_i32 = arith.constant 0 : i32
    %c0_i32_0 = arith.constant 0 : i32
    return %arg0, %c0_i32 : i32, i32
  }
  func.func @transform_1(%arg0: i32) -> (i32, i32) {
    %c0_i32 = arith.constant 0 : i32
    %c0_i32_0 = arith.constant 0 : i32
    return %arg0, %c0_i32 : i32, i32
  }
}

</mosaic_0001>

<bundles_post_ra>
// kernel: tpu_custom_call.1
= control target key start
LH: loop header
LB: loop body
LE: loop exit
PB: predicated region body
PF: predicated region fallthrough
CT: control target
= control target key end

     0   :  { %6 = vsyncpa [#allocation3], 0  ;;  %s477_s0 = inlined_call_operand.hbm [shape: f32[8,1024], index: 0, kind: input, shape index: {}]   ;;  %s478_s1 = inlined_call_operand.hbm [shape: f32[8,1024], index: 1, kind: output, shape index: {}]  }
   0x1   :  { %7 = vsyncpa [#allocation4], 0  ;;  %s310_s6 = smov [#allocation2]   ;;  %s262_s10 = scalar_lea.hbm %s477_s0, 1024 }
   0x2   :  { %s14_s7 = sshll.u32 %s310_s6, 4  ;;  %p263_p0 = scmp.ne.s32.totalorder %s477_s0, %s262_s10  ;;  %s15_s7 = int_to_ptr.vmem [resolvable:$true] %s14_s7 }
   0x3   :  { %p266_p1 = scmp.lt.u32.totalorder %s262_s10, %s477_s0 }
   0x5   :  { %p268_p2 = pnand %p266_p1, %p263_p0 }
   0x7   :  { %271 = shalt.err (!%p268_p2)
}
   0x8   :  { %s272_s15 = scalar_lea.vmem %s15_s7, 1024  ;;  %p277_p4 = scmp.lt.s32.totalorder %s15_s7, %s15_s7 }
   0x9   :  { %p273_p3 = scmp.ne.s32.totalorder %s15_s7, %s272_s15  ;;  %p278_p5 = scmp.lt.s32.totalorder %s272_s15, %s272_s15 }
   0xb   :  { %p279_p6 = por %p278_p5, %p277_p4 }
   0xd   :  { %p280_p7 = pnand %p279_p6, %p273_p3 }
   0xf   :  { %283 = shalt.err (!%p280_p7)
}
  0x10   :  { %17 = dma.hbm_to_vmem [thread:$0]  %s477_s0, 1024, %s15_s7, [#allocation3]  }
  0x11   :  { %306 = dma.done.wait [#allocation3], 1024  }
  0x12   :  { %307 = vsyncadd [#allocation3], 4294966272  ;;  %v334_v0 = vld [vmem:[#allocation2] sm:$0xff]  ;;  %v336_v1 = vld [vmem:[#allocation2 + $0x8] sm:$0xff]  ;;  %s311_s0 = smov [#allocation5]  }
  0x13   :  { %v338_v2 = vld [vmem:[#allocation2 + $0x10] sm:$0xff]  ;;  %v29_v3 = vand.u32 2147483647, %v334_v0  ;;  %v30_v4 = vand.u32 2147483647, %v336_v1  ;;  %v343_v6 = vld [vmem:[#allocation2 + $0x18] sm:$0xff] }
  0x14   :  { %v31_v5 = vand.u32 2147483647, %v338_v2  ;;  %v345_v7 = vld [vmem:[#allocation2 + $0x20] sm:$0xff]  ;;  %v347_v8 = vld [vmem:[#allocation2 + $0x28] sm:$0xff]  ;;  %v32_v11 = vand.u32 2147483647, %v343_v6 }
  0x15   :  { %v37_v9 = vsub.f32 0.0, %v29_v3  ;;  %v38_v10 = vsub.f32 0.0, %v30_v4  ;;  %v350_v12 = vld [vmem:[#allocation2 + $0x30] sm:$0xff]  ;;  %v33_v14 = vand.u32 2147483647, %v345_v7  ;;  %v355_v24 = vld [vmem:[#allocation2 + $0x38] sm:$0xff] }
  0x16   :  { %v39_v13 = vsub.f32 0.0, %v31_v5  ;;  %v34_v15 = vand.u32 2147483647, %v347_v8  ;;  %v40_v18 = vsub.f32 0.0, %v32_v11  ;;  %v35_v22 = vand.u32 2147483647, %v350_v12 }
  0x17   :  { %v45_v16 = vmul.f32 1.442695, %v37_v9  ;;  %v47_v17 = vmul.f32 1.442695, %v38_v10  ;;  %v41_v20 = vsub.f32 0.0, %v33_v14  ;;  %vm61_vm0 = vcmp.ge.f32.partialorder %v334_v0, 0.0 }
  0x18   :  { %v49_v19 = vmul.f32 1.442695, %v39_v13  ;;  %v42_v21 = vsub.f32 0.0, %v34_v15  ;;  %v51_v23 = vmul.f32 1.442695, %v40_v18  ;;  %v43_v28 = vsub.f32 0.0, %v35_v22 }
  0x19   :  { %230 = vpow2.f32 %v45_v16  ;;  %v53_v25 = vmul.f32 1.442695, %v41_v20  ;;  %v36_v27 = vand.u32 2147483647, %v355_v24  ;;  %vm62_vm1 = vcmp.ge.f32.partialorder %v336_v1, 0.0  ;;  %s219_s18 = sshll.u32 %s311_s0, 4  ;;  %s220_s18 = int_to_ptr.vmem [resolvable:$true] %s219_s18 }
  0x1a   :  { %232 = vpow2.f32 %v47_v17  ;;  %v55_v26 = vmul.f32 1.442695, %v42_v21  ;;  %v57_v30 = vmul.f32 1.442695, %v43_v28  ;;  %vm63_vm2 = vcmp.ge.f32.partialorder %v338_v2, 0.0  ;;  %s284_s19 = scalar_lea.vmem %s220_s18, 1024  ;;  %p289_p9 = scmp.lt.s32.totalorder %s220_s18, %s220_s18 }
  0x1b   :  { %234 = vpow2.f32 %v49_v19  ;;  %v44_v29 = vsub.f32 0.0, %v36_v27  ;;  %vm64_vm3 = vcmp.ge.f32.partialorder %v343_v6, 0.0  ;;  %vm65_vm4 = vcmp.ge.f32.partialorder %v345_v7, 0.0  ;;  %p285_p8 = scmp.ne.s32.totalorder %s220_s18, %s284_s19  ;;  %p290_p10 = scmp.lt.s32.totalorder %s284_s19, %s284_s19 }
  0x1c   :  { %236 = vpow2.f32 %v51_v23  ;;  %vm66_vm5 = vcmp.ge.f32.partialorder %v347_v8, 0.0  ;;  %vm67_vm6 = vcmp.ge.f32.partialorder %v350_v12, 0.0  ;;  %vm68_vm7 = vcmp.ge.f32.partialorder %v355_v24, 0.0 }
  0x1d   :  { %238 = vpow2.f32 %v53_v25  ;;  %v59_v31 = vmul.f32 1.442695, %v44_v29  ;;  %p291_p11 = por %p290_p10, %p289_p9 }
  0x1e   :  { %240 = vpow2.f32 %v55_v26 }
  0x1f   :  { %242 = vpow2.f32 %v57_v30  ;;  %p292_p12 = pnand %p291_p11, %p285_p8 }
  0x20   :  { %244 = vpow2.f32 %v59_v31 }
  0x23   :  { %v231_v32 = vpop.eup %230 }
  0x24   :  { %v233_v33 = vpop.eup %232  ;;  %v69_v34 = vmul.f32 2.0, %v231_v32  ;;  %v85_v35 = vadd.f32 2.0, %v231_v32 }
  0x25   :  { %v235_v36 = vpop.eup %234  ;;  %v70_v37 = vmul.f32 2.0, %v233_v33  ;;  %v86_v38 = vadd.f32 2.0, %v233_v33 }
  0x26   :  { %v77_v39 = vadd.f32 1.0, %v69_v34  ;;  %v93_v40 = vmul.f32 %v231_v32, %v85_v35  ;;  %v109_v41 = vmul.f32 %v231_v32, %v69_v34  ;;  %v71_v42 = vmul.f32 2.0, %v235_v36  ;;  %v237_v43 = vpop.eup %236 }
  0x27   :  { %v78_v44 = vadd.f32 1.0, %v70_v37  ;;  %v94_v45 = vmul.f32 %v233_v33, %v86_v38  ;;  %v110_v46 = vmul.f32 %v233_v33, %v70_v37  ;;  %v87_v47 = vadd.f32 2.0, %v235_v36  ;;  %v239_v48 = vpop.eup %238 }
  0x28   :  { %v363_v49 = vsel %vm61_vm0, %v77_v39, %v93_v40  ;;  %v117_v50 = vsel %vm61_vm0, %v109_v41, 2.0  ;;  %v79_v51 = vadd.f32 1.0, %v71_v42  ;;  %v111_v52 = vmul.f32 %v235_v36, %v71_v42  ;;  %v241_v53 = vpop.eup %240 }
  0x29   :  { %v368_v54 = vadd.f32 %v117_v50, %v363_v49  ;;  %v372_v55 = vsel %vm62_vm1, %v78_v44, %v94_v45  ;;  %v118_v56 = vsel %vm62_vm1, %v110_v46, 2.0  ;;  %v95_v58 = vmul.f32 %v235_v36, %v87_v47  ;;  %v243_v11 = vpop.eup %242 }
  0x2a   :  { %v377_v57 = vadd.f32 %v118_v56, %v372_v55  ;;  %v119_v59 = vsel %vm63_vm2, %v111_v52, 2.0  ;;  %v72_v60 = vmul.f32 2.0, %v237_v43  ;;  %v88_v61 = vadd.f32 2.0, %v237_v43  ;;  %v245_v17 = vpop.eup %244 }
  0x2b   :  { %246 = vrcp.f32 %v368_v54  ;;  %v73_v62 = vmul.f32 2.0, %v239_v48  ;;  %v386_v63 = vsel %vm63_vm2, %v79_v51, %v95_v58  ;;  %v89_v3 = vadd.f32 2.0, %v239_v48 }
  0x2c   :  { %248 = vrcp.f32 %v377_v57  ;;  %v74_v4 = vmul.f32 2.0, %v241_v53  ;;  %v389_v5 = vadd.f32 %v119_v59, %v386_v63  ;;  %v80_v9 = vadd.f32 1.0, %v72_v60 }
  0x2d   :  { %v96_v10 = vmul.f32 %v237_v43, %v88_v61  ;;  %v112_v13 = vmul.f32 %v237_v43, %v72_v60  ;;  %v81_v14 = vadd.f32 1.0, %v73_v62  ;;  %v97_v15 = vmul.f32 %v239_v48, %v89_v3 }
  0x2e   :  { %v113_v16 = vmul.f32 %v239_v48, %v73_v62  ;;  %250 = vrcp.f32 %v389_v5  ;;  %v82_v19 = vadd.f32 1.0, %v74_v4  ;;  %v90_v20 = vadd.f32 2.0, %v241_v53 }
  0x2f   :  { %v395_v18 = vsel %vm64_vm3, %v80_v9, %v96_v10  ;;  %v120_v21 = vsel %vm64_vm3, %v112_v13, 2.0  ;;  %v399_v22 = vsel %vm65_vm4, %v81_v14, %v97_v15  ;;  %v114_v28 = vmul.f32 %v241_v53, %v74_v4 }
  0x30   :  { %v121_v23 = vsel %vm65_vm4, %v113_v16, 2.0  ;;  %v403_v25 = vadd.f32 %v120_v21, %v395_v18  ;;  %v98_v27 = vmul.f32 %v241_v53, %v90_v20  ;;  %v75_v29 = vmul.f32 2.0, %v243_v11 }
  0x31   :  { %v406_v26 = vadd.f32 %v121_v23, %v399_v22  ;;  %v91_v30 = vadd.f32 2.0, %v243_v11  ;;  %v76_v31 = vmul.f32 2.0, %v245_v17  ;;  %v92_v33 = vadd.f32 2.0, %v245_v17 }
  0x32   :  { %252 = vrcp.f32 %v403_v25  ;;  %v409_v32 = vsel %vm66_vm5, %v82_v19, %v98_v27  ;;  %v122_v34 = vsel %vm66_vm5, %v114_v28, 2.0  ;;  %v83_v35 = vadd.f32 1.0, %v75_v29 }
  0x33   :  { %254 = vrcp.f32 %v406_v26  ;;  %v415_v37 = vadd.f32 %v122_v34, %v409_v32  ;;  %v99_v38 = vmul.f32 %v243_v11, %v91_v30  ;;  %v115_v39 = vmul.f32 %v243_v11, %v75_v29 }
  0x34   :  { %v84_v40 = vadd.f32 1.0, %v76_v31  ;;  %v100_v43 = vmul.f32 %v245_v17, %v92_v33  ;;  %v116_v44 = vmul.f32 %v245_v17, %v76_v31  ;;  %v189_v13 = vmul.f32 %v363_v49, %v334_v0 }
  0x35   :  { %v247_v36 = vpop.eup %246  ;;  %256 = vrcp.f32 %v415_v37  ;;  %v422_v46 = vsel %vm67_vm6, %v83_v35, %v99_v38  ;;  %v123_v47 = vsel %vm67_vm6, %v115_v39, 2.0  ;;  %v190_v17 = vmul.f32 %v372_v55, %v336_v1 }
  0x36   :  { %v249_v41 = vpop.eup %248  ;;  %v141_v42 = vmul.f32 %v247_v36, %v368_v54  ;;  %v427_v50 = vadd.f32 %v123_v47, %v422_v46  ;;  %v431_v51 = vsel %vm68_vm7, %v84_v40, %v100_v43  ;;  %v124_v56 = vsel %vm68_vm7, %v116_v44, 2.0 }
  0x37   :  { %v142_v45 = vmul.f32 %v249_v41, %v377_v57  ;;  %v132_v60 = vadd.f32 %v124_v56, %v431_v51  ;;  %v191_v27 = vmul.f32 %v386_v63, %v338_v2  ;;  %v192_v39 = vmul.f32 %v395_v18, %v343_v6 }
  0x38   :  { %v149_v48 = vsub.f32 2.0, %v141_v42  ;;  %v251_v52 = vpop.eup %250  ;;  %258 = vrcp.f32 %v427_v50  ;;  %v193_v42 = vmul.f32 %v399_v22, %v345_v7  ;;  %v194_v56 = vmul.f32 %v409_v32, %v347_v8 }
  0x39   :  { %v150_v53 = vsub.f32 2.0, %v142_v45  ;;  %v143_v59 = vmul.f32 %v251_v52, %v389_v5  ;;  %260 = vrcp.f32 %v132_v60 }
  0x3a   :  { %v157_v58 = vmul.f32 %v247_v36, %v149_v48 }
  0x3b   :  { %v158_v61 = vmul.f32 %v249_v41, %v150_v53  ;;  %v151_v3 = vsub.f32 2.0, %v143_v59  ;;  %v195_v59 = vmul.f32 %v422_v46, %v350_v12 }
  0x3c   :  { %v165_v62 = vmul.f32 %v157_v58, %v368_v54  ;;  %v253_v4 = vpop.eup %252 }
  0x3d   :  { %v166_v9 = vmul.f32 %v158_v61, %v377_v57  ;;  %v255_v10 = vpop.eup %254  ;;  %v159_v14 = vmul.f32 %v251_v52, %v151_v3  ;;  %v144_v15 = vmul.f32 %v253_v4, %v403_v25 }
  0x3e   :  { %v173_v11 = vsub.f32 2.0, %v165_v62  ;;  %v145_v19 = vmul.f32 %v255_v10, %v406_v26 }
  0x3f   :  { %v174_v16 = vsub.f32 2.0, %v166_v9  ;;  %v167_v20 = vmul.f32 %v159_v14, %v389_v5  ;;  %v152_v21 = vsub.f32 2.0, %v144_v15  ;;  %v257_v23 = vpop.eup %256 }
  0x40   :  { %v181_v54 = vmul.f32 %v173_v11, %v157_v58  ;;  %v153_v28 = vsub.f32 2.0, %v145_v19  ;;  %v146_v30 = vmul.f32 %v257_v23, %v415_v37 }
  0x41   :  { %v182_v57 = vmul.f32 %v174_v16, %v158_v61  ;;  %v175_v49 = vsub.f32 2.0, %v167_v20  ;;  %v160_v29 = vmul.f32 %v253_v4, %v152_v21  ;;  %v196_v4 = vmul.f32 %v431_v51, %v355_v24 }
  0x42   :  { %v197_v0 = vmul.f32 %v189_v13, %v181_v54  ;;  %v161_v33 = vmul.f32 %v255_v10, %v153_v28  ;;  %v259_v1 = vpop.eup %258  ;;  %v154_v5 = vsub.f32 2.0, %v146_v30 }
  0x43   :  { %v198_v31 = vmul.f32 %v190_v17, %v182_v57  ;;  %v183_v55 = vmul.f32 %v175_v49, %v159_v14  ;;  %v168_v34 = vmul.f32 %v160_v29, %v403_v25  ;;  %v147_v36 = vmul.f32 %v259_v1, %v427_v50  ;;  %v261_v2 = vpop.eup %260 }
  0x44   :  { %205 = vst [vmem:[#allocation5] sm:$0xff] %v197_v0  ;;  %v169_v35 = vmul.f32 %v161_v33, %v406_v26  ;;  %v162_v40 = vmul.f32 %v257_v23, %v154_v5  ;;  %v148_v44 = vmul.f32 %v261_v2, %v132_v60 }
  0x45   :  { %206 = vst [vmem:[#allocation5 + $0x8] sm:$0xff] %v198_v31  ;;  %v199_v63 = vmul.f32 %v191_v27, %v183_v55  ;;  %v176_v38 = vsub.f32 2.0, %v168_v34  ;;  %v155_v43 = vsub.f32 2.0, %v147_v36 }
  0x46   :  { %v177_v41 = vsub.f32 2.0, %v169_v35  ;;  %v170_v45 = vmul.f32 %v162_v40, %v415_v37  ;;  %v156_v48 = vsub.f32 2.0, %v148_v44 }
  0x47   :  { %207 = vst [vmem:[#allocation5 + $0x10] sm:$0xff] %v199_v63  ;;  %v184_v25 = vmul.f32 %v176_v38, %v160_v29  ;;  %v163_v47 = vmul.f32 %v259_v1, %v155_v43 }
  0x48   :  { %v185_v26 = vmul.f32 %v177_v41, %v161_v33  ;;  %v178_v53 = vsub.f32 2.0, %v170_v45  ;;  %v164_v58 = vmul.f32 %v261_v2, %v156_v48 }
  0x49   :  { %v200_v52 = vmul.f32 %v192_v39, %v184_v25  ;;  %v171_v18 = vmul.f32 %v163_v47, %v427_v50 }
  0x4a   :  { %v201_v6 = vmul.f32 %v193_v42, %v185_v26  ;;  %v186_v7 = vmul.f32 %v178_v53, %v162_v40  ;;  %v172_v37 = vmul.f32 %v164_v58, %v132_v60 }
  0x4b   :  { %208 = vst [vmem:[#allocation5 + $0x18] sm:$0xff] %v200_v52  ;;  %v179_v22 = vsub.f32 2.0, %v171_v18 }
  0x4c   :  { %209 = vst [vmem:[#allocation5 + $0x20] sm:$0xff] %v201_v6  ;;  %v202_v61 = vmul.f32 %v194_v56, %v186_v7  ;;  %v180_v3 = vsub.f32 2.0, %v172_v37 }
  0x4d   :  { %v187_v62 = vmul.f32 %v179_v22, %v163_v47 }
  0x4e   :  { %210 = vst [vmem:[#allocation5 + $0x28] sm:$0xff] %v202_v61  ;;  %v188_v32 = vmul.f32 %v180_v3, %v164_v58 }
  0x4f   :  { %v203_v8 = vmul.f32 %v195_v59, %v187_v62 }
  0x50   :  { %v204_v50 = vmul.f32 %v196_v4, %v188_v32 }
  0x51   :  { %211 = vst [vmem:[#allocation5 + $0x30] sm:$0xff] %v203_v8 }
  0x52   :  { %212 = vst [vmem:[#allocation5 + $0x38] sm:$0xff] %v204_v50 }
  0x53   :  { %295 = shalt.err (!%p292_p12)
}
  0x54   :  { %s296_s22 = scalar_lea.hbm %s478_s1, 1024 }
  0x55   :  { %p297_p13 = scmp.ne.s32.totalorder %s478_s1, %s296_s22  ;;  %p300_p0 = scmp.lt.u32.totalorder %s296_s22, %s478_s1 }
  0x57   :  { %p302_p1 = pnand %p300_p0, %p297_p13 }
  0x59   :  { %305 = shalt.err (!%p302_p1)
}
  0x5a   :  { %222 = dma.vmem_to_hbm [thread:$0]  %s220_s18, 1024, %s478_s1, [#allocation4]  }
  0x5b   :  { %308 = dma.done.wait [#allocation4], 1024  }
  0x5c   :  { %309 = vsyncadd [#allocation4], 4294966272 }
  0x5d   :  { %226 = vsyncpa [#allocation3], 1 }
  0x5e   :  { %227 = vsyncpa [#allocation4], 1 }

</bundles_post_ra>
